<compile_context>
chip_gen: v6e
topology: v6e:2x2x1
jax: 0.10.0
libtpu: 0.0.40
codegen_flags: <defaults>
</compile_context>

<pallas_src>
import jax
import jax.numpy as jnp
from jax.experimental import pallas as pl
from jax.experimental.pallas import tpu as pltpu

CONST_SCALE = 0.18215


# --------------------------- layout helpers ----------------------------------

def _flatten_dense_2d(total):
    """Pick a (rows, lanes) flattening with lanes a multiple of 128 (prefer wide)
    and rows a multiple of 8, so every vreg is fully populated."""
    for lanes in (1024, 512, 256, 128):
        if total % (lanes * 8) == 0:
            return total // lanes, lanes
    return None


def _pick_block_rows(rows, lanes, itemsize, target_bytes=2 << 20):
    """Largest multiple-of-8 divisor of `rows` whose block is <= ~target_bytes."""
    max_rows = max(8, (target_bytes // (lanes * itemsize)) // 8 * 8)
    cand = min(rows, max_rows)
    cand -= cand % 8
    cand = max(cand, 8)
    while cand > 8 and rows % cand != 0:
        cand -= 8
    return cand


_VMEM_SPEC = pl.BlockSpec(memory_space=pltpu.MemorySpace.VMEM)


# --------------------------- Pallas kernels ----------------------------------

def _img_postprocess_kernel(x_ref, out_ref):
    # imgs = (decoded / 2 + 0.5).clamp(0, 1)
    out_ref[...] = jnp.clip(x_ref[...] * 0.5 + 0.5, 0.0, 1.0)


# ------------------------------ wrappers --------------------------------------

def add_noise(latents, noise, sqrt_alpha_cumprod, sqrt_one_minus_alpha_cumprod):
    """latents, noise: (B, C, H, W). Coefficients are baked as compile-time consts."""
    sa = float(sqrt_alpha_cumprod)
    s1 = float(sqrt_one_minus_alpha_cumprod)
    orig_shape = latents.shape
    flat = _flatten_dense_2d(latents.size)
    if flat is not None:
        lat = latents.reshape(flat)
        nse = noise.reshape(flat)
    else:  # fallback: whole array, original trailing dims
        lat, nse = latents, noise

    def kernel(lat_ref, noise_ref, out_ref):
        out_ref[...] = sa * lat_ref[...] + s1 * noise_ref[...]

    out = pl.pallas_call(
        kernel,
        out_shape=jax.ShapeDtypeStruct(lat.shape, lat.dtype),
        in_specs=[_VMEM_SPEC, _VMEM_SPEC],
        out_specs=_VMEM_SPEC,
        input_output_aliases={0: 0},   # reuse latent buffer for the output
    )(lat, nse)
    return out.reshape(orig_shape)


def cfg_guidance(noise_pred, latent_mask, guidance_scale, image_guidance_scale):
    """noise_pred: (3B, C, Hl, Wl) stacked [text | image | uncond] chunks.
    latent_mask: (Hl, Wl) binary {0,1} mask (already nearest-downsampled by 8).
    Scales are Python floats (as in edit_image) -> baked as constants."""
    g = float(guidance_scale)
    ig = float(image_guidance_scale)
    threeB, C, Hl, Wl = noise_pred.shape
    B = threeB // 3
    HW = Hl * Wl
    # Single unsliced input: (3, B*C, HW) — chunk axis first, lane-dense HW last.
    np_flat = noise_pred.reshape(3, B * C, HW)
    mask2 = latent_mask.reshape(1, HW).astype(noise_pred.dtype)

    def kernel(mask_ref, np_ref, out_ref):
        soft_mask = jnp.where(mask_ref[...] > 0.5, 1.0, 0.3)   # (1, HW)
        npt = np_ref[0]   # text
        npi = np_ref[1]   # image
        npu = np_ref[2]   # uncond
        out_ref[...] = npu + g * (npt - npi) * soft_mask + ig * (npi - npu)

    # TODO(synk): the scheduler.step() latent update (immediate consumer of this
    # output in edit_image) is scheduler-config dependent and not re-implemented;
    # when it is, fold its elementwise update into this kernel to save one full
    # read+write of the latents per denoising iteration.
    out = pl.pallas_call(
        kernel,
        out_shape=jax.ShapeDtypeStruct((B * C, HW), noise_pred.dtype),
        in_specs=[_VMEM_SPEC, _VMEM_SPEC],
        out_specs=_VMEM_SPEC,
    )(mask2, np_flat)
    return out.reshape(B, C, Hl, Wl)


def img_postprocess(decoded):
    """decoded: (B, 3, H, W) raw VAE-decoder output -> images in [0, 1]."""
    shape = decoded.shape
    flat = _flatten_dense_2d(decoded.size)
    if flat is None:
        # Fallback: whole array, single block (trailing dims are full extents).
        out = pl.pallas_call(
            _img_postprocess_kernel,
            out_shape=jax.ShapeDtypeStruct(shape, decoded.dtype),
            in_specs=[_VMEM_SPEC],
            out_specs=_VMEM_SPEC,
        )(decoded)
        return out

    rows, lanes = flat
    x2 = decoded.reshape(rows, lanes)
    block_rows = _pick_block_rows(rows, lanes, decoded.dtype.itemsize)
    grid = (rows // block_rows,)
    out = pl.pallas_call(
        _img_postprocess_kernel,
        out_shape=jax.ShapeDtypeStruct((rows, lanes), decoded.dtype),
        grid=grid,
        in_specs=[pl.BlockSpec((block_rows, lanes), lambda i: (i, 0))],
        out_specs=pl.BlockSpec((block_rows, lanes), lambda i: (i, 0)),
        compiler_params=pltpu.CompilerParams(dimension_semantics=("parallel",)),
    )(x2)
    return out.reshape(shape)


# ------------------------- deterministic "scheduler" --------------------------

def make_alphas_cumprod(num_train_timesteps=1000):
    # Stable-Diffusion scaled_linear beta schedule (deterministic, no checkpoint).
    betas = jnp.linspace(0.00085 ** 0.5, 0.012 ** 0.5, num_train_timesteps,
                         dtype=jnp.float32) ** 2
    alphas = 1.0 - betas
    return jnp.cumprod(alphas)


def downsample_mask_nearest(mask, factor=8):
    # F.interpolate(mode='nearest') with integer scale: picks src index i*factor.
    return mask[::factor, ::factor]


# ----------------------------------- main --------------------------------------

if __name__ == "__main__":
    key = jax.random.PRNGKey(0)
    k1, k2, k3, k4, k5 = jax.random.split(key, 5)

    # Small shapes consistent with edit_image(): image (B,3,128,128) -> latents (B,4,16,16)
    B, C_lat, H_img, W_img = 2, 4, 128, 128
    H_lat, W_lat = H_img // 8, W_img // 8

    guidance_scale = 7.5
    image_guidance_scale = 1.5
    num_train_timesteps = 1000

    latents = jax.random.normal(k1, (B, C_lat, H_lat, W_lat), dtype=jnp.float32) * CONST_SCALE
    noise = jax.random.normal(k2, (B, C_lat, H_lat, W_lat), dtype=jnp.float32)
    # noise_pred from the UNet: (3B, 4, Hl, Wl), chunks = [text, image, uncond]
    noise_pred = jax.random.normal(k3, (3 * B, C_lat, H_lat, W_lat), dtype=jnp.float32)
    # binary edit mask at full image resolution
    mask = (jax.random.uniform(k4, (H_img, W_img)) > 0.5).astype(jnp.float32)
    # raw VAE-decoder output stand-in (the decoder itself is not translated)
    decoded_raw = jax.random.normal(k5, (B, 3, H_img, W_img), dtype=jnp.float32)

    # scheduler.add_noise coefficients at a deterministic timestep T inside
    # [lower_bound, upper_bound] * num_train_timesteps
    alphas_cumprod = make_alphas_cumprod(num_train_timesteps)
    t0 = int(0.98 * num_train_timesteps) - 1
    sqrt_ac = jnp.sqrt(alphas_cumprod[t0])
    sqrt_1m_ac = jnp.sqrt(1.0 - alphas_cumprod[t0])

    latent_mask = downsample_mask_nearest(mask, 8)          # (16, 16)

    # --- pure-JAX references (computed up-front) ------------------------------
    ref_noisy = sqrt_ac * latents + sqrt_1m_ac * noise
    soft_mask = jnp.where(latent_mask > 0.5, 1.0, 0.3)[None, None]   # (1,1,16,16)
    npt, npi, npu = jnp.split(noise_pred, 3, axis=0)
    ref_guided = npu + guidance_scale * (npt - npi) * soft_mask \
        + image_guidance_scale * (npi - npu)
    ref_imgs = jnp.clip(decoded_raw * 0.5 + 0.5, 0.0, 1.0)

    # --- run the Pallas kernels -----------------------------------------------
    noisy_latents = add_noise(latents, noise, sqrt_ac, sqrt_1m_ac)
    guided = cfg_guidance(noise_pred, latent_mask, guidance_scale, image_guidance_scale)
    # TODO(synk): self.unet / self.auto_encoder (pretrained diffusers models) and
    # scheduler.step() internals are not re-implemented; only their elementwise
    # pre/post processing is done here.
    imgs = img_postprocess(decoded_raw)

    jax.block_until_ready((noisy_latents, guided, imgs))

    assert jnp.allclose(noisy_latents, ref_noisy, atol=1e-5, rtol=1e-5)
    assert jnp.allclose(guided, ref_guided, atol=1e-5, rtol=1e-5)
    assert jnp.allclose(imgs, ref_imgs, atol=1e-6, rtol=1e-6)

    print("KERNEL_OK")
</pallas_src>

<mosaic_0001>
module attributes {stable_mosaic.version = 11 : i64} {
  func.func @kernel(%arg0: memref<8x256xf32, #tpu.memory_space<vmem>>, %arg1: memref<8x256xf32, #tpu.memory_space<vmem>>, %arg2: memref<8x256xf32, #tpu.memory_space<vmem>>) attributes {dimension_semantics = [], scalar_prefetch = 0 : i64, scratch_operands = 0 : i64, tpu.core_type = #tpu.core_type<tc>} {
    %c0 = arith.constant 0 : index
    %c0_0 = arith.constant 0 : index
    %0 = vector.load %arg0[%c0, %c0_0] : memref<8x256xf32, #tpu.memory_space<vmem>>, vector<8x256xf32>
    %cst = arith.constant 0.0768945441 : f32
    %1 = vector.broadcast %cst : f32 to vector<8x256xf32>
    %2 = arith.mulf %1, %0 : vector<8x256xf32>
    %c0_1 = arith.constant 0 : index
    %c0_2 = arith.constant 0 : index
    %3 = vector.load %arg1[%c0_1, %c0_2] : memref<8x256xf32, #tpu.memory_space<vmem>>, vector<8x256xf32>
    %cst_3 = arith.constant 0.997039198 : f32
    %4 = vector.broadcast %cst_3 : f32 to vector<8x256xf32>
    %5 = arith.mulf %4, %3 : vector<8x256xf32>
    %6 = arith.addf %2, %5 : vector<8x256xf32>
    %c0_4 = arith.constant 0 : index
    %c0_5 = arith.constant 0 : index
    %7 = vector.load %arg2[%c0_4, %c0_5] : memref<8x256xf32, #tpu.memory_space<vmem>>, vector<8x256xf32>
    tpu.vector_store %arg2[%c0_4, %c0_5], %6 {strides = array<i32>} : memref<8x256xf32, #tpu.memory_space<vmem>>, vector<8x256xf32>,
    return
  }
}

</mosaic_0001>

<bundles_post_ra>
// kernel: tpu_custom_call.1
= control target key start
LH: loop header
LB: loop body
LE: loop exit
PB: predicated region body
PF: predicated region fallthrough
CT: control target
= control target key end

     0   :  { %7 = vsyncpa [#allocation3], 0  ;;  %s126_s0 = inlined_call_operand.hbm [shape: f32[8,256], index: 0, kind: input, shape index: {}, may-alias: {0,2}]   ;;  %s127_s1 = inlined_call_operand.vmem [shape: f32[8,256], index: 1, kind: input, shape index: {}]   ;;  %s128_s2 = inlined_call_operand.hbm [shape: f32[8,256], index: 2, kind: output, shape index: {}, may-alias: {0,2}]  }
   0x1   :  { %8 = vsyncpa [#allocation4], 0  ;;  %s97_s9 = smov [#allocation2]  }
   0x2   :  { %s15_s10 = sshll.u32 %s97_s9, 4  ;;  %s16_s10 = int_to_ptr.vmem [resolvable:$true] %s15_s10 }
   0x3   :  { %s61_s11 = scalar_lea.vmem %s16_s10, 256  ;;  %p66_p1 = scmp.lt.s32.totalorder %s16_s10, %s16_s10 }
   0x4   :  { %p62_p0 = scmp.ne.s32.totalorder %s16_s10, %s61_s11  ;;  %p67_p2 = scmp.lt.s32.totalorder %s61_s11, %s61_s11 }
   0x6   :  { %p68_p3 = por %p67_p2, %p66_p1 }
   0x8   :  { %p69_p4 = pnand %p68_p3, %p62_p0 }
   0xa   :  { %72 = shalt.err (!%p69_p4)
}
   0xb   :  { %18 = dma.hbm_to_vmem [thread:$0]  %s126_s0, 256, %s16_s10, [#allocation3]  }
   0xc   :  { %93 = dma.done.wait [#allocation3], 256  }
   0xd   :  { %94 = vsyncadd [#allocation3], 4294967040  ;;  %v24_v0 = vld [vmem:[#allocation2] sm:$0xff]  ;;  %v25_v2 = vld [vmem:[#allocation2 + $0x8] sm:$0xff]  ;;  %s98_s18 = smov [#allocation5]  }
   0xe   :  { %v28_v1 = vld [vmem:[%s127_s1] sm:$0xff]  ;;  %v26_v3 = vmul.f32 0.076894544, %v24_v0  ;;  %v27_v5 = vmul.f32 0.076894544, %v25_v2  ;;  %v29_v6 = vld [vmem:[%s127_s1 + $0x8] sm:$0xff] }
   0xf   :  { %v30_v4 = vmul.f32 0.9970392, %v28_v1  ;;  %s42_s19 = sshll.u32 %s98_s18, 4  ;;  %v31_v8 = vmul.f32 0.9970392, %v29_v6  ;;  %s43_s19 = int_to_ptr.vmem [resolvable:$true] %s42_s19 }
  0x10   :  { %s73_s0 = scalar_lea.vmem %s43_s19, 256  ;;  %p78_p6 = scmp.lt.s32.totalorder %s43_s19, %s43_s19 }
  0x11   :  { %v32_v7 = vadd.f32 %v30_v4, %v26_v3  ;;  %v33_v9 = vadd.f32 %v31_v8, %v27_v5  ;;  %p74_p5 = scmp.ne.s32.totalorder %s43_s19, %s73_s0  ;;  %p79_p7 = scmp.lt.s32.totalorder %s73_s0, %s73_s0 }
  0x13   :  { %34 = vst [vmem:[#allocation5] sm:$0xff] %v32_v7  ;;  %35 = vst [vmem:[#allocation5 + $0x8] sm:$0xff] %v33_v9  ;;  %p80_p8 = por %p79_p7, %p78_p6 }
  0x15   :  { %p81_p9 = pnand %p80_p8, %p74_p5 }
  0x17   :  { %84 = shalt.err (!%p81_p9)
}
  0x18   :  { %45 = dma.vmem_to_hbm [thread:$0]  %s43_s19, 256, %s128_s2, [#allocation4]  }
  0x19   :  { %95 = dma.done.wait [#allocation4], 256  }
  0x1a   :  { %96 = vsyncadd [#allocation4], 4294967040 }
  0x1b   :  { %49 = vsyncpa [#allocation3], 1 }
  0x1c   :  { %50 = vsyncpa [#allocation4], 1 }

</bundles_post_ra>
